<compile_context>
chip_gen: v7x
topology: tpu7x:2x2x1
jax: 0.10.0
libtpu: 0.0.40
codegen_flags: <defaults>
</compile_context>

<pallas_src>
import functools

import jax
import jax.numpy as jnp
from jax.experimental import pallas as pl
from jax.experimental.pallas import tpu as pltpu

NUM_CLASSES = 32          # synthetic classifier head (labels 0..24 fit inside)
INPUT_CHARACTER_DIM = 8   # params['input_character_dim']


def _round_up(n, m):
    return (n + m - 1) // m * m


def _ce_loss_kernel(patch_ref, onehot_ref, w_ref, b_ref, loss_ref, *, inv_batch):
    """One row-tile of the stacked-patch cross-entropy.

    patch_ref  : [TM, F]   rows = patch-major stacking (row p*B + b), zero-padded
    onehot_ref : [TM, NC]  one-hot labels; all-zero rows mark padding
    w_ref      : [F, NC]   classifier weight (resident every step)
    b_ref      : [1, NC]   classifier bias
    loss_ref   : [1, 1]    resident accumulator across the row-tile grid axis
    """
    t = pl.program_id(0)

    @pl.when(t == 0)
    def _():
        loss_ref[...] = jnp.zeros_like(loss_ref)

    logits = jnp.dot(patch_ref[...], w_ref[...],
                     preferred_element_type=jnp.float32)          # [TM, NC]
    logits = logits + b_ref[...]                                  # broadcast [1, NC]

    # numerically-stable logsumexp over classes
    m = jnp.max(logits, axis=-1, keepdims=True)                   # [TM, 1]
    lse = jnp.log(jnp.sum(jnp.exp(logits - m),
                          axis=-1, keepdims=True)) + m            # [TM, 1]

    oh = onehot_ref[...]                                          # [TM, NC]
    picked = jnp.sum(oh * logits, axis=-1, keepdims=True)         # [TM, 1]
    valid = jnp.sum(oh, axis=-1, keepdims=True)                   # [TM, 1] (0 on pad)

    # per-row CE contribution; padded rows contribute exactly 0
    partial = jnp.sum(valid * lse - picked, axis=0, keepdims=True)  # [1, 1]
    loss_ref[...] = loss_ref[...] + partial

    @pl.when(t == pl.num_programs(0) - 1)
    def _():
        # sum over 25 patches of mean-over-batch CE == sum over rows / B
        loss_ref[...] = loss_ref[...] * inv_batch


def classification_loss(x, w, b, dim=INPUT_CHARACTER_DIM, row_tile=1024):
    """Returns (x, loss) — forward() returns x; self.loss is the side output."""
    B, C, H, W = x.shape
    assert H == 5 * dim and W == 5 * dim
    F_ = C * dim * dim
    NC = w.shape[1]

    # glue: extract the 5x5 grid of letter patches, flatten to [25*B, F]
    # (row = patch*B + batch); allow_input_fusion lets XLA try to fuse this
    # relayout into operand 0 of the pallas_call.
    patches = x.reshape(B, C, 5, dim, 5, dim)        # [B, C, i, hi, j, wj]
    patches = patches.transpose(2, 4, 0, 1, 3, 5)    # [i, j, B, C, hi, wj]
    patches = patches.reshape(25 * B, F_)

    # explicit one-hot labels (label for row r is r // B == patch index i*5+j)
    R = 25 * B
    labels = jnp.arange(R, dtype=jnp.int32) // B
    onehot = jax.nn.one_hot(labels, NC, dtype=jnp.float32)        # [R, NC]

    # adaptive row tile: multiple of 8, capped at `row_tile`; pad rows so the
    # grid divides evenly (padded rows have all-zero one-hot => contribute 0).
    TM = min(row_tile, _round_up(R, 8))
    R_pad = _round_up(R, TM)
    if R_pad != R:
        patches = jnp.pad(patches, ((0, R_pad - R), (0, 0)))
        onehot = jnp.pad(onehot, ((0, R_pad - R), (0, 0)))
    num_tiles = R_pad // TM

    loss = pl.pallas_call(
        functools.partial(_ce_loss_kernel, inv_batch=1.0 / B),
        out_shape=jax.ShapeDtypeStruct((1, 1), jnp.float32),
        grid_spec=pltpu.PrefetchScalarGridSpec(
            num_scalar_prefetch=0,
            grid=(num_tiles,),
            in_specs=[
                pl.BlockSpec((TM, F_), lambda t: (t, 0)),   # patch row-tile
                pl.BlockSpec((TM, NC), lambda t: (t, 0)),   # one-hot row-tile
                pl.BlockSpec((F_, NC), lambda t: (0, 0)),   # classifier weight (resident)
                pl.BlockSpec((1, NC), lambda t: (0, 0)),    # classifier bias (resident)
            ],
            out_specs=pl.BlockSpec((1, 1), lambda t: (0, 0)),  # resident accumulator
        ),
        compiler_params=pltpu.CompilerParams(
            dimension_semantics=("arbitrary",),            # accumulator axis
            allow_input_fusion=[0],                         # fuse patch relayout if XLA agrees
        ),
    )(patches, onehot, w, b.reshape(1, NC))

    # TODO(synk): the original classification_model returns (scores, _, _) and the
    # module accumulates self.loss across forward calls; only per-call scores/loss
    # are modeled here.
    return x, loss.reshape(1)


if __name__ == "__main__":
    B, C, dim = 2, 4, INPUT_CHARACTER_DIM
    F_ = C * dim * dim

    key = jax.random.PRNGKey(0)
    kx, kw, kb = jax.random.split(key, 3)
    x = jax.random.normal(kx, (B, C, 5 * dim, 5 * dim), dtype=jnp.float32)
    w = 0.02 * jax.random.normal(kw, (F_, NUM_CLASSES), dtype=jnp.float32)
    b = 0.02 * jax.random.normal(kb, (NUM_CLASSES,), dtype=jnp.float32)

    out, loss = classification_loss(x, w, b, dim)
    jax.block_until_ready((out, loss))

    # pure-JAX reference (mirrors the PyTorch double loop exactly)
    def ref_loss(x):
        total = jnp.zeros(())
        for i in range(5):
            for j in range(5):
                xl = x[:, :, i * dim:(i + 1) * dim, j * dim:(j + 1) * dim]
                logits = xl.reshape(B, -1) @ w + b
                lab = i * 5 + j
                lse = jax.nn.logsumexp(logits, axis=-1)
                total = total + jnp.mean(lse - logits[:, lab])
        return total

    ref = ref_loss(x)
    assert jnp.allclose(loss[0], ref, rtol=1e-5, atol=1e-5), (loss[0], ref)
    assert jnp.array_equal(out, x)
    print("KERNEL_OK")
</pallas_src>

<mosaic_0001>
module attributes {stable_mosaic.version = 11 : i64} {
  func.func @_ce_loss_kernel(%arg0: i32, %arg1: memref<56x256xf32, #tpu.memory_space<vmem>>, %arg2: memref<56x32xf32, #tpu.memory_space<vmem>>, %arg3: memref<256x32xf32, #tpu.memory_space<vmem>>, %arg4: memref<1x32xf32, #tpu.memory_space<vmem>>, %arg5: memref<1x1xf32, #tpu.memory_space<vmem>>) attributes {dimension_semantics = [#tpu.dimension_semantics<arbitrary>], iteration_bounds = array<i64: 1>, scalar_prefetch = 0 : i64, scratch_operands = 0 : i64, tpu.core_type = #tpu.core_type<tc>, window_params = [{transform_indices = @transform_0, window_bounds = array<i64: 56, 256>}, {transform_indices = @transform_1, window_bounds = array<i64: 56, 32>}, {pipeline_mode = #tpu.pipeline_mode<synchronous>, transform_indices = @transform_2, window_bounds = array<i64: 256, 32>}, {pipeline_mode = #tpu.pipeline_mode<synchronous>, transform_indices = @transform_3, window_bounds = array<i64: 1, 32>}, {pipeline_mode = #tpu.pipeline_mode<synchronous>, transform_indices = @transform_4, window_bounds = array<i64: 1, 1>}]} {
    %c0_i32 = arith.constant 0 : i32
    %0 = arith.cmpi eq, %arg0, %c0_i32 : i32
    %1 = arith.extui %0 : i1 to i32
    %c0_i32_0 = arith.constant 0 : i32
    %2 = arith.cmpi ne, %1, %c0_i32_0 : i32
    scf.if %2 {
      %cst_19 = arith.constant 0.000000e+00 : f32
      %34 = vector.broadcast %cst_19 : f32 to vector<1x1xf32>
      %c0_20 = arith.constant 0 : index
      %c0_21 = arith.constant 0 : index
      %35 = vector.load %arg5[%c0_20, %c0_21] : memref<1x1xf32, #tpu.memory_space<vmem>>, vector<1x1xf32>
      tpu.vector_store %arg5[%c0_20, %c0_21], %34 {strides = array<i32>} : memref<1x1xf32, #tpu.memory_space<vmem>>, vector<1x1xf32>,
    } else {
    }
    %c0 = arith.constant 0 : index
    %c0_1 = arith.constant 0 : index
    %3 = vector.load %arg1[%c0, %c0_1] : memref<56x256xf32, #tpu.memory_space<vmem>>, vector<56x256xf32>
    %c0_2 = arith.constant 0 : index
    %c0_3 = arith.constant 0 : index
    %4 = vector.load %arg3[%c0_2, %c0_3] : memref<256x32xf32, #tpu.memory_space<vmem>>, vector<256x32xf32>
    %cst = arith.constant dense<0.000000e+00> : vector<56x32xf32>
    %5 = tpu.matmul %3, %4, %cst {dimension_numbers = #tpu.dot_dimension_numbers<[1], [0], [0], [1], [0, 0, 1, 1], [], []>} : vector<56x256xf32>, vector<256x32xf32>, vector<56x32xf32> -> vector<56x32xf32>
    %c0_4 = arith.constant 0 : index
    %c0_5 = arith.constant 0 : index
    %6 = vector.load %arg4[%c0_4, %c0_5] : memref<1x32xf32, #tpu.memory_space<vmem>>, vector<1x32xf32>
    %7 = vector.broadcast %6 : vector<1x32xf32> to vector<56x32xf32>
    %8 = arith.addf %5, %7 : vector<56x32xf32>
    %cst_6 = arith.constant dense<0xFF800000> : vector<56xf32>
    %9 = vector.multi_reduction <maximumf>, %8, %cst_6 [1] : vector<56x32xf32> to vector<56xf32>
    %10 = vector.shape_cast %9 : vector<56xf32> to vector<56x1xf32>
    %11 = vector.broadcast %10 : vector<56x1xf32> to vector<56x32xf32>
    %12 = arith.subf %8, %11 : vector<56x32xf32>
    %13 = math.exp %12 : vector<56x32xf32>
    %cst_7 = arith.constant dense<0.000000e+00> : vector<56xf32>
    %14 = vector.multi_reduction <add>, %13, %cst_7 [1] : vector<56x32xf32> to vector<56xf32>
    %15 = vector.shape_cast %14 : vector<56xf32> to vector<56x1xf32>
    %16 = math.log %15 : vector<56x1xf32>
    %17 = arith.addf %16, %10 : vector<56x1xf32>
    %c0_8 = arith.constant 0 : index
    %c0_9 = arith.constant 0 : index
    %18 = vector.load %arg2[%c0_8, %c0_9] : memref<56x32xf32, #tpu.memory_space<vmem>>, vector<56x32xf32>
    %19 = arith.mulf %18, %8 : vector<56x32xf32>
    %cst_10 = arith.constant dense<0.000000e+00> : vector<56xf32>
    %20 = vector.multi_reduction <add>, %19, %cst_10 [1] : vector<56x32xf32> to vector<56xf32>
    %21 = vector.shape_cast %20 : vector<56xf32> to vector<56x1xf32>
    %cst_11 = arith.constant dense<0.000000e+00> : vector<56xf32>
    %22 = vector.multi_reduction <add>, %18, %cst_11 [1] : vector<56x32xf32> to vector<56xf32>
    %23 = vector.shape_cast %22 : vector<56xf32> to vector<56x1xf32>
    %24 = arith.mulf %23, %17 : vector<56x1xf32>
    %25 = arith.subf %24, %21 : vector<56x1xf32>
    %cst_12 = arith.constant dense<0.000000e+00> : vector<1xf32>
    %26 = vector.multi_reduction <add>, %25, %cst_12 [0] : vector<56x1xf32> to vector<1xf32>
    %27 = vector.shape_cast %26 : vector<1xf32> to vector<1x1xf32>
    %c0_13 = arith.constant 0 : index
    %c0_14 = arith.constant 0 : index
    %28 = vector.load %arg5[%c0_13, %c0_14] : memref<1x1xf32, #tpu.memory_space<vmem>>, vector<1x1xf32>
    %29 = arith.addf %28, %27 : vector<1x1xf32>
    %c0_15 = arith.constant 0 : index
    %c0_16 = arith.constant 0 : index
    %30 = vector.load %arg5[%c0_15, %c0_16] : memref<1x1xf32, #tpu.memory_space<vmem>>, vector<1x1xf32>
    tpu.vector_store %arg5[%c0_15, %c0_16], %29 {strides = array<i32>} : memref<1x1xf32, #tpu.memory_space<vmem>>, vector<1x1xf32>,
    %c0_i32_17 = arith.constant 0 : i32
    %31 = arith.cmpi eq, %arg0, %c0_i32_17 : i32
    %32 = arith.extui %31 : i1 to i32
    %c0_i32_18 = arith.constant 0 : i32
    %33 = arith.cmpi ne, %32, %c0_i32_18 : i32
    scf.if %33 {
      %c0_19 = arith.constant 0 : index
      %c0_20 = arith.constant 0 : index
      %34 = vector.load %arg5[%c0_19, %c0_20] : memref<1x1xf32, #tpu.memory_space<vmem>>, vector<1x1xf32>
      %cst_21 = arith.constant 5.000000e-01 : f32
      %35 = vector.broadcast %cst_21 : f32 to vector<1x1xf32>
      %36 = arith.mulf %34, %35 : vector<1x1xf32>
      %c0_22 = arith.constant 0 : index
      %c0_23 = arith.constant 0 : index
      %37 = vector.load %arg5[%c0_22, %c0_23] : memref<1x1xf32, #tpu.memory_space<vmem>>, vector<1x1xf32>
      tpu.vector_store %arg5[%c0_22, %c0_23], %36 {strides = array<i32>} : memref<1x1xf32, #tpu.memory_space<vmem>>, vector<1x1xf32>,
    } else {
    }
    return
  }
  func.func @transform_0(%arg0: i32) -> (i32, i32) {
    %c0_i32 = arith.constant 0 : i32
    %c0_i32_0 = arith.constant 0 : i32
    return %arg0, %c0_i32 : i32, i32
  }
  func.func @transform_1(%arg0: i32) -> (i32, i32) {
    %c0_i32 = arith.constant 0 : i32
    %c0_i32_0 = arith.constant 0 : i32
    return %arg0, %c0_i32 : i32, i32
  }
  func.func @transform_2(%arg0: i32) -> (i32, i32) {
    %c0_i32 = arith.constant 0 : i32
    %c0_i32_0 = arith.constant 0 : i32
    %c0_i32_1 = arith.constant 0 : i32
    return %c0_i32, %c0_i32_0 : i32, i32
  }
  func.func @transform_3(%arg0: i32) -> (i32, i32) {
    %c0_i32 = arith.constant 0 : i32
    %c0_i32_0 = arith.constant 0 : i32
    %c0_i32_1 = arith.constant 0 : i32
    return %c0_i32, %c0_i32_0 : i32, i32
  }
  func.func @transform_4(%arg0: i32) -> (i32, i32) {
    %c0_i32 = arith.constant 0 : i32
    %c0_i32_0 = arith.constant 0 : i32
    %c0_i32_1 = arith.constant 0 : i32
    return %c0_i32, %c0_i32_0 : i32, i32
  }
}

</mosaic_0001>

<bundles_post_ra>
// kernel: tpu_custom_call.1
= control target key start
LH: loop header
LB: loop body
LE: loop exit
PB: predicated region body
PF: predicated region fallthrough
CT: control target
= control target key end

     0   :  { %s819_s0 = inlined_call_operand.vmem [shape: f32[56,256], index: 0, kind: input, shape index: {}]   ;;  %s820_s1 = inlined_call_operand.vmem [shape: f32[56,32], index: 1, kind: input, shape index: {}]   ;;  %s821_s2 = inlined_call_operand.vmem [shape: f32[256,32], index: 2, kind: input, shape index: {}]   ;;  %s822_s3 = inlined_call_operand.vmem [shape: f32[1,32], index: 3, kind: input, shape index: {}]   ;;  %s823_s4 = inlined_call_operand.hbm [shape: f32[1,1], index: 4, kind: output, shape index: {}]  }
   0x1   :  { %v54_v0 = vld [vmem:[%s821_s2 + $0x80] sm:$0xff]  ;;  %v55_v1 = vld [vmem:[%s821_s2 + $0x88] sm:$0xff]  ;;  %v56_v5 = vld [vmem:[%s821_s2 + $0x90] sm:$0xff] }
   0x2   :  { %v38_v2 = vld [vmem:[%s821_s2] sm:$0xff]  ;;  %v422_v3 = vpack.c.bf16 %v55_v1, %v54_v0  ;;  %v39_v4 = vld [vmem:[%s821_s2 + $0x8] sm:$0xff]  ;;  %v57_v6 = vld [vmem:[%s821_s2 + $0x98] sm:$0xff] }
   0x3   :  { %v424_v7 = vpack.c.bf16 %v39_v4, %v38_v2  ;;  %v426_v8 = vpack.c.bf16 %v57_v6, %v56_v5  ;;  %v40_v9 = vld [vmem:[%s821_s2 + $0x10] sm:$0xff]  ;;  %v41_v10 = vld [vmem:[%s821_s2 + $0x18] sm:$0xff]  ;;  %v58_v11 = vld [vmem:[%s821_s2 + $0xa0] sm:$0xff] }
   0x4   :  { %423 = vmatprep.subr.bf16.mxu0 %v422_v3  ;;  %454 = vmatprep.subr.bf16.mxu1 %v422_v3  ;;  %v59_v12 = vld [vmem:[%s821_s2 + $0xa8] sm:$0xff]  ;;  %v428_v13 = vpack.c.bf16 %v41_v10, %v40_v9  ;;  %v42_v15 = vld [vmem:[%s821_s2 + $0x20] sm:$0xff]  ;;  %v60_v17 = vld [vmem:[%s821_s2 + $0xb0] sm:$0xff] }
   0x5   :  { %425 = vmatpush3.bf16.msra.mxu0 %v424_v7  ;;  %462 = vmatpush3.bf16.msra.mxu1 %v424_v7  ;;  %v430_v14 = vpack.c.bf16 %v59_v12, %v58_v11  ;;  %v43_v16 = vld [vmem:[%s821_s2 + $0x28] sm:$0xff]  ;;  %v61_v18 = vld [vmem:[%s821_s2 + $0xb8] sm:$0xff]  ;;  %v44_v21 = vld [vmem:[%s821_s2 + $0x30] sm:$0xff] }
   0x6   :  { %427 = vmatprep.subr.bf16.mxu0 %v426_v8  ;;  %455 = vmatprep.subr.bf16.mxu1 %v426_v8  ;;  %v432_v19 = vpack.c.bf16 %v43_v16, %v42_v15  ;;  %v434_v20 = vpack.c.bf16 %v61_v18, %v60_v17  ;;  %v45_v22 = vld [vmem:[%s821_s2 + $0x38] sm:$0xff]  ;;  %v62_v23 = vld [vmem:[%s821_s2 + $0xc0] sm:$0xff]  ;;  %v63_v24 = vld [vmem:[%s821_s2 + $0xc8] sm:$0xff] }
   0x7   :  { %v25_v25 = vld [vmem:[%s819_s0 + $0x8] sm:$0xff]  ;;  %v436_v27 = vpack.c.bf16 %v45_v22, %v44_v21  ;;  %v438_v28 = vpack.c.bf16 %v63_v24, %v62_v23  ;;  %v46_v29 = vld [vmem:[%s821_s2 + $0x40] sm:$0xff]  ;;  %v64_v31 = vld [vmem:[%s821_s2 + $0xd0] sm:$0xff] }
   0x8   :  { %141 = vmatprep.mubr.f32.mxu0 %v25_v25  ;;  %v33_v26 = vld [vmem:[%s819_s0 + $0x48] sm:$0xff]  ;;  %v65_v32 = vld [vmem:[%s821_s2 + $0xd8] sm:$0xff] }
   0x9   :  { %429 = vmatpush3.bf16.msra.mxu0 %v428_v13  ;;  %463 = vmatpush3.bf16.msra.mxu1 %v428_v13  ;;  %v47_v30 = vld [vmem:[%s821_s2 + $0x48] sm:$0xff] }
   0xa   :  { %431 = vmatprep.subr.bf16.mxu0 %v430_v14  ;;  %456 = vmatprep.subr.bf16.mxu1 %v430_v14 }
   0xb   :  { %161 = vmatprep.mubr.f32.mxu1 %v33_v26 }
   0xd   :  { %433 = vmatpush3.bf16.msra.mxu0 %v432_v19  ;;  %464 = vmatpush3.bf16.msra.mxu1 %v432_v19 }
   0xe   :  { %435 = vmatprep.subr.bf16.mxu0 %v434_v20  ;;  %457 = vmatprep.subr.bf16.mxu1 %v434_v20 }
   0xf   :  { %9 = vsyncpa [#allocation3], 0  ;;  %v440_v33 = vpack.c.bf16 %v47_v30, %v46_v29  ;;  %v442_v34 = vpack.c.bf16 %v65_v32, %v64_v31  ;;  %v48_v35 = vld [vmem:[%s821_s2 + $0x50] sm:$0xff]  ;;  %v49_v36 = vld [vmem:[%s821_s2 + $0x58] sm:$0xff]  ;;  %vm177_vm0 = vcmask 261120   ;;  %vm22_vm1 = vcmask 0  }
  0x10   :  { %v66_v37 = vld [vmem:[%s821_s2 + $0xe0] sm:$0xff]  ;;  %v67_v38 = vld [vmem:[%s821_s2 + $0xe8] sm:$0xff]  ;;  %v444_v39 = vpack.c.bf16 %v49_v36, %v48_v35  ;;  %v68_v43 = vld [vmem:[%s821_s2 + $0xf0] sm:$0xff] }
  0x11   :  { %437 = vmatpush3.bf16.msra.mxu0 %v436_v27  ;;  %465 = vmatpush3.bf16.msra.mxu1 %v436_v27  ;;  %v446_v40 = vpack.c.bf16 %v67_v38, %v66_v37  ;;  %v50_v41 = vld [vmem:[%s821_s2 + $0x60] sm:$0xff]  ;;  %v51_v42 = vld [vmem:[%s821_s2 + $0x68] sm:$0xff]  ;;  %v69_v44 = vld [vmem:[%s821_s2 + $0xf8] sm:$0xff] }
  0x12   :  { %439 = vmatprep.subr.bf16.mxu0 %v438_v28  ;;  %458 = vmatprep.subr.bf16.mxu1 %v438_v28  ;;  %v448_v45 = vpack.c.bf16 %v51_v42, %v50_v41  ;;  %v450_v46 = vpack.c.bf16 %v69_v44, %v68_v43  ;;  %v52_v47 = vld [vmem:[%s821_s2 + $0x70] sm:$0xff]  ;;  %v53_v48 = vld [vmem:[%s821_s2 + $0x78] sm:$0xff]  ;;  %v24_v50 = vld [vmem:[%s819_s0] sm:$0xff] }
  0x13   :  { %v452_v49 = vpack.c.bf16 %v53_v48, %v52_v47  ;;  %v32_v51 = vld [vmem:[%s819_s0 + $0x40] sm:$0xff]  ;;  %v27_v52 = vld [vmem:[%s819_s0 + $0x18] sm:$0xff]  ;;  %v26_v54 = vld [vmem:[%s819_s0 + $0x10] sm:$0xff] }
  0x14   :  { %v35_v53 = vld [vmem:[%s819_s0 + $0x58] sm:$0xff]  ;;  %v34_v55 = vld [vmem:[%s819_s0 + $0x50] sm:$0xff]  ;;  %v29_v56 = vld [vmem:[%s819_s0 + $0x28] sm:$0xff] }
  0x15   :  { %441 = vmatpush3.bf16.msra.mxu0 %v440_v33  ;;  %466 = vmatpush3.bf16.msra.mxu1 %v440_v33  ;;  %v37_v57 = vld [vmem:[%s819_s0 + $0x68] sm:$0xff]  ;;  %v28_v58 = vld [vmem:[%s819_s0 + $0x20] sm:$0xff]  ;;  %v31_v60 = vld [vmem:[%s819_s0 + $0x38] sm:$0xff] }
  0x16   :  { %443 = vmatprep.subr.bf16.mxu0 %v442_v34  ;;  %459 = vmatprep.subr.bf16.mxu1 %v442_v34  ;;  %v36_v59 = vld [vmem:[%s819_s0 + $0x60] sm:$0xff]  ;;  %v30_v61 = vld [vmem:[%s819_s0 + $0x30] sm:$0xff]  ;;  %v263_v34 = vld [vmem:[%s820_s1 + $0x8] sm:$0xff] }
  0x17   :  { %v368_v0 = vld [vmem:[%s822_s3] ss:$0 sm:$0xff]  ;;  %v300_v35 = vsel %vm177_vm0, %v263_v34, 0.0 }
  0x18   :  { %v262_v36 = vld [vmem:[%s820_s1] sm:$0xff] }
  0x19   :  { %445 = vmatpush3.bf16.msra.mxu0 %v444_v39  ;;  %467 = vmatpush3.bf16.msra.mxu1 %v444_v39  ;;  %v297_v37 = vsel %vm177_vm0, %v262_v36, 0.0 }
  0x1a   :  { %447 = vmatprep.subr.bf16.mxu0 %v446_v40  ;;  %460 = vmatprep.subr.bf16.mxu1 %v446_v40 }
  0x1d   :  { %449 = vmatpush3.bf16.msra.mxu0 %v448_v45  ;;  %468 = vmatpush3.bf16.msra.mxu1 %v448_v45 }
  0x1e   :  { %451 = vmatprep.subr.bf16.mxu0 %v450_v46  ;;  %461 = vmatprep.subr.bf16.mxu1 %v450_v46 }
  0x21   :  { %453 = vmatpush3.bf16.msra.mxu0 %v452_v49  ;;  %469 = vmatpush3.bf16.msra.mxu1 %v452_v49 }
  0x24   :  { %142 = vmatmul.mubr.f32.vlgmr.msra.gmra.mrb[0].mxu0 %v24_v50  ;;  %162 = vmatmul.mubr.f32.vlgmr.msra.gmra.mrb[0].mxu1 %v32_v51 }
  0x25   :  { %146 = vmatprep.mubr.f32.mxu0 %v27_v52  ;;  %166 = vmatprep.mubr.f32.mxu1 %v35_v53 }
  0x28   :  { %147 = vmatmul.mubr.f32.gmra.mrb[2].mxu0 %v26_v54  ;;  %167 = vmatmul.mubr.f32.gmra.mrb[2].mxu1 %v34_v55 }
  0x29   :  { %151 = vmatprep.mubr.f32.mxu0 %v29_v56  ;;  %171 = vmatprep.mubr.f32.mxu1 %v37_v57 }
  0x2c   :  { %152 = vmatmul.mubr.f32.gmra.mrb[4].mxu0 %v28_v58  ;;  %172 = vmatmul.mubr.f32.gmra.mrb[4].mxu1 %v36_v59 }
  0x2d   :  { %156 = vmatprep.mubr.f32.mxu0 %v31_v60 }
  0x30   :  { %157 = vmatmul.mubr.f32.gmra.mrb[6].mxu0 %v30_v61 }
  0xf7   :  { %v401_v62 = vpop.f32.mrb[0].mxu0  ;;  %v413_v63 = vpop.f32.mrb[0].mxu1 }
  0xf8   :  { %v402_v1 = vpop.f32.mrb[1].mxu0  ;;  %v414_v2 = vpop.f32.mrb[1].mxu1 }
  0xf9   :  { %v403_v3 = vadd.f32 %v402_v1, %v401_v62  ;;  %v415_v4 = vadd.f32 %v414_v2, %v413_v63 }
  0xfb   :  { %v692_v5 = vadd.f32 %v403_v3, %v368_v0  ;;  %v404_v6 = vpop.f32.mrb[2].mxu0  ;;  %v416_v7 = vpop.f32.mrb[2].mxu1  ;;  %v698_v15 = vadd.f32 %v415_v4, %v368_v0 }
  0xfc   :  { %v405_v8 = vpop.f32.mrb[3].mxu0  ;;  %v417_v9 = vpop.f32.mrb[3].mxu1 }
  0xfd   :  { %v406_v10 = vadd.f32 %v405_v8, %v404_v6  ;;  %v178_v11 = vsel %vm177_vm0, %v692_v5, -inf  ;;  %v418_v12 = vadd.f32 %v417_v9, %v416_v7  ;;  %v190_v25 = vsel %vm177_vm0, %v698_v15, -inf }
  0xfe   :  { %179 = vmax.xlane.f32.xlu0 %v178_v11 }
  0xff   :  { %v696_v13 = vadd.f32 %v406_v10, %v368_v0  ;;  %v407_v14 = vpop.f32.mrb[4].mxu0  ;;  %v419_v16 = vpop.f32.mrb[4].mxu1  ;;  %v710_v29 = vadd.f32 %v418_v12, %v368_v0  ;;  %v264_v10 = vld [vmem:[%s820_s1 + $0x10] sm:$0xff]  ;;  %v269_v12 = vmul.f32 %v262_v36, %v692_v5 }
 0x100   :  { %v408_v17 = vpop.f32.mrb[5].mxu0  ;;  %v420_v18 = vpop.f32.mrb[5].mxu1 }
 0x101   :  { %v409_v19 = vadd.f32 %v408_v17, %v407_v14  ;;  %v181_v20 = vsel %vm177_vm0, %v696_v13, -inf  ;;  %v421_v21 = vadd.f32 %v420_v18, %v419_v16  ;;  %v193_v33 = vsel %vm177_vm0, %v710_v29, -inf  ;;  %v265_v17 = vld [vmem:[%s820_s1 + $0x18] sm:$0xff] }
 0x102   :  { %182 = vmax.xlane.f32.xlu0 %v181_v20  ;;  %v270_v9 = vmul.f32 %v263_v34, %v696_v13  ;;  %v266_v20 = vld [vmem:[%s820_s1 + $0x20] sm:$0xff]  ;;  %v524_v34 = vmov 0.0  }
 0x103   :  { %v702_v22 = vadd.f32 %v409_v19, %v368_v0  ;;  %v410_v23 = vpop.f32.mrb[6].mxu0  ;;  %v704_v24 = vadd.f32 %v421_v21, %v368_v0  ;;  %23 = vst.msk [vmem:[#allocation2] sm:$0x1] %vm22_vm1, %v524_v34 }
 0x104   :  { %v411_v26 = vpop.f32.mrb[7].mxu0  ;;  %v279_v14 = vsel %vm177_vm0, %v270_v9, 0.0 }
 0x105   :  { %v412_v27 = vadd.f32 %v411_v26, %v410_v23  ;;  %v184_v28 = vsel %vm177_vm0, %v702_v22, -inf  ;;  %v196_v31 = vsel %vm177_vm0, %v704_v24, -inf  ;;  %v271_v16 = vmul.f32 %v264_v10, %v702_v22 }
 0x106   :  { %185 = vmax.xlane.f32.xlu1 %v184_v28  ;;  %191 = vmax.xlane.f32.xlu0 %v190_v25  ;;  %v306_v23 = vsel %vm177_vm0, %v265_v17, 0.0  ;;  %v267_v25 = vld [vmem:[%s820_s1 + $0x28] sm:$0xff]  ;;  %v309_v28 = vsel %vm177_vm0, %v266_v20, 0.0 }
 0x107   :  { %v712_v30 = vadd.f32 %v412_v27, %v368_v0  ;;  %v282_v18 = vsel %vm177_vm0, %v271_v16, 0.0  ;;  %v274_v27 = vmul.f32 %v267_v25, %v710_v29 }
 0x109   :  { %v187_v32 = vsel %vm177_vm0, %v712_v30, -inf  ;;  %v272_v19 = vmul.f32 %v265_v17, %v712_v30 }
 0x10a   :  { %188 = vmax.xlane.f32.xlu1 %v187_v32  ;;  %197 = vmax.xlane.f32.xlu0 %v196_v31  ;;  %v312_v32 = vsel %vm177_vm0, %v267_v25, 0.0 }
 0x10b   :  { %v285_v21 = vsel %vm177_vm0, %v272_v19, 0.0 }
 0x10e   :  { %194 = vmax.xlane.f32.xlu1 %v193_v33  ;;  %298 = vadd.xlane.f32.xlu0 %v297_v37 }
 0x112   :  { %301 = vadd.xlane.f32.xlu1 %v300_v35 }
 0x18b   :  { %v728_v38 = vpop.xlane.xlu0 %179 }
 0x18c   :  { %v199_v39 = vsub.f32 %v692_v5, %v728_v38  ;;  %v303_v5 = vsel %vm177_vm0, %v264_v10, 0.0 }
 0x18e   :  { %v206_v40 = vmul.f32 1.442695, %v199_v39 }
 0x18f   :  { %v732_v41 = vpop.xlane.xlu0 %182 }
 0x190   :  { %472 = vpow2.f32 %v206_v40  ;;  %v200_v42 = vsub.f32 %v696_v13, %v732_v41  ;;  %v276_v13 = vsel %vm177_vm0, %v269_v12, 0.0 }
 0x192   :  { %v208_v43 = vmul.f32 1.442695, %v200_v42 }
 0x193   :  { %v736_v44 = vpop.xlane.xlu1 %185  ;;  %v738_v45 = vpop.xlane.xlu0 %191 }
 0x194   :  { %474 = vpow2.f32 %v208_v43  ;;  %v201_v46 = vsub.f32 %v702_v22, %v736_v44  ;;  %v203_v47 = vsub.f32 %v698_v15, %v738_v45  ;;  %v273_v22 = vmul.f32 %v266_v20, %v698_v15 }
 0x195   :  { %v291_v15 = vsel %vm177_vm0, %v274_v27, 0.0 }
 0x196   :  { %v214_v48 = vmul.f32 1.442695, %v203_v47  ;;  %v210_v49 = vmul.f32 1.442695, %v201_v46  ;;  %v288_v26 = vsel %vm177_vm0, %v273_v22, 0.0 }
 0x197   :  { %v744_v50 = vpop.xlane.xlu1 %188  ;;  %v746_v51 = vpop.xlane.xlu0 %197 }
 0x198   :  { %v205_v52 = vsub.f32 %v704_v24, %v746_v51  ;;  %476 = vpow2.f32 %v214_v48  ;;  %v202_v54 = vsub.f32 %v712_v30, %v744_v50  ;;  %v268_v30 = vld [vmem:[%s820_s1 + $0x30] sm:$0xff]  ;;  %s525_s1 = smov [#allocation2]  }
 0x199   :  { %478 = vpow2.f32 %v210_v49  ;;  %v275_v31 = vmul.f32 %v268_v30, %v704_v24  ;;  %s360_s15 = sshll.u32 %s525_s1, 4  ;;  %s361_s15 = int_to_ptr.vmem [resolvable:$true] %s360_s15 }
 0x19a   :  { %v473_v53 = vpop.eup %472  ;;  %v218_v55 = vmul.f32 1.442695, %v205_v52  ;;  %v212_v60 = vmul.f32 1.442695, %v202_v54  ;;  %s500_s16 = scalar_lea.vmem %s361_s15, 16  ;;  %s504_s17 = scalar_lea.vmem %s361_s15, 32 }
 0x19b   :  { %v752_v56 = vpop.xlane.xlu1 %194  ;;  %v220_v57 = vsel %vm177_vm0, %v473_v53, 0.0  ;;  %v294_v33 = vsel %vm177_vm0, %v275_v31, 0.0  ;;  %v299_v36 = vpop.xlane.xlu0 %298  ;;  %p501_p0 = scmp.ne.s32.totalorder %s361_s15, %s500_s16  ;;  %p505_p1 = scmp.lt.s32.totalorder %s361_s15, %s361_s15 }
 0x19c   :  { %v204_v58 = vsub.f32 %v710_v29, %v752_v56  ;;  %221 = vadd.xlane.f32.xlu1 %v220_v57  ;;  %480 = vpow2.f32 %v218_v55  ;;  %v315_v29 = vsel %vm177_vm0, %v268_v30, 0.0  ;;  %p506_p2 = scmp.lt.s32.totalorder %s504_s17, %s500_s16 }
 0x19e   :  { %v475_v59 = vpop.eup %474  ;;  %v216_v61 = vmul.f32 1.442695, %v204_v58  ;;  %p507_p3 = por %p506_p2, %p505_p1 }
 0x19f   :  { %v223_v62 = vsel %vm177_vm0, %v475_v59, 0.0  ;;  %v302_v35 = vpop.xlane.xlu1 %301 }
 0x1a0   :  { %482 = vpow2.f32 %v216_v61  ;;  %224 = vadd.xlane.f32.xlu0 %v223_v62  ;;  %p508_p4 = pnand %p507_p3, %p501_p0 }
 0x1a1   :  { %484 = vpow2.f32 %v212_v60 }
 0x1a2   :  { %v477_v63 = vpop.eup %476 }
 0x1a3   :  { %v232_v0 = vsel %vm177_vm0, %v477_v63, 0.0  ;;  %v479_v1 = vpop.eup %478 }
 0x1a4   :  { %233 = vadd.xlane.f32.xlu1 %v232_v0  ;;  %v226_v2 = vsel %vm177_vm0, %v479_v1, 0.0 }
 0x1a6   :  { %v481_v3 = vpop.eup %480 }
 0x1a7   :  { %v238_v8 = vsel %vm177_vm0, %v481_v3, 0.0 }
 0x1a8   :  { %227 = vadd.xlane.f32.xlu1 %v226_v2 }
 0x1aa   :  { %v483_v4 = vpop.eup %482 }
 0x1ab   :  { %v235_v6 = vsel %vm177_vm0, %v483_v4, 0.0  ;;  %v485_v7 = vpop.eup %484 }
 0x1ac   :  { %236 = vadd.xlane.f32.xlu0 %v235_v6  ;;  %239 = vadd.xlane.f32.xlu1 %v238_v8  ;;  %v229_v11 = vsel %vm177_vm0, %v485_v7, 0.0 }
 0x1b0   :  { %230 = vadd.xlane.f32.xlu0 %v229_v11  ;;  %280 = vadd.xlane.f32.xlu1 %v279_v14 }
 0x1b4   :  { %277 = vadd.xlane.f32.xlu0 %v276_v13  ;;  %283 = vadd.xlane.f32.xlu1 %v282_v18 }
 0x1b8   :  { %304 = vadd.xlane.f32.xlu0 %v303_v5  ;;  %286 = vadd.xlane.f32.xlu1 %v285_v21 }
 0x1bc   :  { %307 = vadd.xlane.f32.xlu0 %v306_v23  ;;  %289 = vadd.xlane.f32.xlu1 %v288_v26 }
 0x1c0   :  { %310 = vadd.xlane.f32.xlu0 %v309_v28  ;;  %292 = vadd.xlane.f32.xlu1 %v291_v15 }
 0x1c4   :  { %313 = vadd.xlane.f32.xlu0 %v312_v32  ;;  %295 = vadd.xlane.f32.xlu1 %v294_v33 }
 0x1c8   :  { %316 = vadd.xlane.f32.xlu0 %v315_v29 }
 0x229   :  { %v222_v37 = vpop.xlane.xlu1 %221 }
 0x22a   :  { %486 = vlog2.f32 %v222_v37 }
 0x22d   :  { %v225_v39 = vpop.xlane.xlu0 %224 }
 0x22e   :  { %488 = vlog2.f32 %v225_v39 }
 0x231   :  { %v234_v24 = vpop.xlane.xlu1 %233 }
 0x234   :  { %v487_v46 = vpop.eup %486 }
 0x235   :  { %v228_v40 = vpop.xlane.xlu1 %227  ;;  %v242_v52 = vmul.f32 0.6931472, %v487_v46 }
 0x236   :  { %490 = vlog2.f32 %v228_v40 }
 0x237   :  { %492 = vlog2.f32 %v234_v24  ;;  %v255_v59 = vadd.f32 %v242_v52, %v728_v38 }
 0x238   :  { %v489_v47 = vpop.eup %488 }
 0x239   :  { %v237_v42 = vpop.xlane.xlu0 %236  ;;  %v240_v43 = vpop.xlane.xlu1 %239  ;;  %v244_v53 = vmul.f32 0.6931472, %v489_v47  ;;  %v318_v1 = vmul.f32 %v299_v36, %v255_v59 }
 0x23b   :  { %v256_v60 = vadd.f32 %v244_v53, %v732_v41 }
 0x23d   :  { %v231_v48 = vpop.xlane.xlu0 %230  ;;  %v281_v49 = vpop.xlane.xlu1 %280  ;;  %v319_v2 = vmul.f32 %v302_v35, %v256_v60 }
 0x23e   :  { %494 = vlog2.f32 %v231_v48 }
 0x23f   :  { %496 = vlog2.f32 %v237_v42  ;;  %v326_v11 = vsub.f32 %v319_v2, %v281_v49 }
 0x240   :  { %v491_v54 = vpop.eup %490  ;;  %498 = vlog2.f32 %v240_v43 }
 0x241   :  { %v278_v55 = vpop.xlane.xlu0 %277  ;;  %v246_v57 = vmul.f32 0.6931472, %v491_v54  ;;  %v284_v58 = vpop.xlane.xlu1 %283 }
 0x242   :  { %v493_v62 = vpop.eup %492  ;;  %v325_v9 = vsub.f32 %v318_v1, %v278_v55 }
 0x243   :  { %v257_v61 = vadd.f32 %v246_v57, %v736_v44  ;;  %v250_v6 = vmul.f32 0.6931472, %v493_v62 }
 0x244   :  { %v332_v17 = vadd.f32 %v326_v11, %v325_v9 }
 0x245   :  { %v305_v63 = vpop.xlane.xlu0 %304  ;;  %v287_v0 = vpop.xlane.xlu1 %286  ;;  %v259_v44 = vadd.f32 %v250_v6, %v738_v45 }
 0x246   :  { %v320_v3 = vmul.f32 %v305_v63, %v257_v61 }
 0x248   :  { %v495_v4 = vpop.eup %494  ;;  %v327_v12 = vsub.f32 %v320_v3, %v284_v58 }
 0x249   :  { %v497_v7 = vpop.eup %496  ;;  %v248_v8 = vmul.f32 0.6931472, %v495_v4  ;;  %v308_v10 = vpop.xlane.xlu0 %307 }
 0x24a   :  { %v290_v38 = vpop.xlane.xlu1 %289  ;;  %v252_v41 = vmul.f32 0.6931472, %v497_v7  ;;  %v499_v16 = vpop.eup %498  ;;  %v333_v5 = vadd.f32 %v332_v17, %v327_v12 }
 0x24b   :  { %v258_v14 = vadd.f32 %v248_v8, %v744_v50  ;;  %v254_v21 = vmul.f32 0.6931472, %v499_v16 }
 0x24c   :  { %v260_v23 = vadd.f32 %v252_v41, %v752_v56  ;;  %v344_v56 = vld [vmem:[#allocation2] sm:$0x1] }
 0x24d   :  { %v321_v13 = vmul.f32 %v308_v10, %v258_v14  ;;  %v311_v18 = vpop.xlane.xlu0 %310  ;;  %v261_v15 = vadd.f32 %v254_v21, %v746_v51 }
 0x24e   :  { %v322_v19 = vmul.f32 %v311_v18, %v259_v44  ;;  %v293_v26 = vpop.xlane.xlu1 %292 }
 0x24f   :  { %v328_v20 = vsub.f32 %v321_v13, %v287_v0 }
 0x250   :  { %v329_v22 = vsub.f32 %v322_v19, %v290_v38 }
 0x251   :  { %v334_v25 = vadd.f32 %v333_v5, %v328_v20  ;;  %v314_v27 = vpop.xlane.xlu0 %313 }
 0x252   :  { %v323_v28 = vmul.f32 %v314_v27, %v260_v23  ;;  %v296_v32 = vpop.xlane.xlu1 %295 }
 0x253   :  { %v335_v30 = vadd.f32 %v334_v25, %v329_v22 }
 0x254   :  { %v330_v50 = vsub.f32 %v323_v28, %v293_v26 }
 0x255   :  { %v317_v45 = vpop.xlane.xlu0 %316 }
 0x256   :  { %v324_v31 = vmul.f32 %v317_v45, %v261_v15  ;;  %v336_v33 = vadd.f32 %v335_v30, %v330_v50 }
 0x258   :  { %v331_v29 = vsub.f32 %v324_v31, %v296_v32 }
 0x25a   :  { %v337_v34 = vadd.f32 %v336_v33, %v331_v29 }
 0x25c   :  { %v338_v35 = vrot.slane %v337_v34, 4 }
 0x25e   :  { %v339_v36 = vadd.f32 %v338_v35, %v337_v34 }
 0x260   :  { %v340_v37 = vrot.slane %v339_v36, 2 }
 0x262   :  { %v341_v39 = vadd.f32 %v340_v37, %v339_v36 }
 0x264   :  { %v342_v24 = vrot.slane %v341_v39, 1 }
 0x266   :  { %v343_v40 = vadd.f32 %v342_v24, %v341_v39 }
 0x268   :  { %v345_v42 = vadd.f32 %v344_v56, %v343_v40 }
 0x26a   :  { %347 = vst.msk [vmem:[#allocation2] sm:$0x1] %vm22_vm1, %v345_v42 }
 0x271   :  { %v351_v43 = vld [vmem:[#allocation2] sm:$0x1] }
 0x272   :  { %v352_v51 = vmul.f32 0.5, %v351_v43 }
 0x274   :  { %353 = vst.msk [vmem:[#allocation2] sm:$0x1] %vm22_vm1, %v352_v51 }
 0x275   :  { %511 = shalt.err (!%p508_p4)
}
 0x276   :  { %s512_s20 = scalar_lea.hbm %s823_s4, 16 }
 0x277   :  { %p513_p5 = scmp.ne.s32.totalorder %s823_s4, %s512_s20  ;;  %p516_p6 = scmp.lt.u32.totalorder %s512_s20, %s823_s4 }
 0x279   :  { %p518_p7 = pnand %p516_p6, %p513_p5 }
 0x27b   :  { %521 = shalt.err (!%p518_p7)
}
 0x27c   :  { %363 = dma.vmem_to_hbm [thread:$0]  %s361_s15, 16, %s823_s4, [#allocation3]  }
 0x27d   :  { %522 = dma.done.wait [#allocation3], 16  }
 0x27e   :  { %523 = vsyncadd [#allocation3], 4294967280 }
 0x27f   :  { %367 = vsyncpa [#allocation3], 1 }

</bundles_post_ra>
